<compile_context>
chip_gen: v5e
topology: v5e:2x2
jax: 0.10.0
libtpu: 0.0.40
codegen_flags: <defaults>
</compile_context>

<pallas_src>
import functools

import numpy as np
import jax
import jax.numpy as jnp
from jax.experimental import pallas as pl
from jax.experimental.pallas import tpu as pltpu


def _round_up(x, m):
    return ((x + m - 1) // m) * m


@functools.lru_cache(maxsize=1)
def _vmem_capacity_bytes():
    """Physical VMEM per core (generation aware), with a conservative fallback."""
    try:
        cap = int(pltpu.get_tpu_info().vmem_capacity_bytes)
        if cap > 0:
            return cap
    except Exception:
        pass
    return 64 * 1024 * 1024  # v7x-sized fallback


def _mlp_kernel(x_ref, w1_ref, b1_ref, w2_ref, b2_ref, o_ref):
    # x arrives in its original (f32) dtype; cast on the VPU (no-op if f32).
    x = x_ref[...].astype(w1_ref.dtype)
    h = jnp.dot(x, w1_ref[...], preferred_element_type=jnp.float32)
    h = jnp.maximum(h + b1_ref[...], 0.0)          # bias + ReLU in f32
    h = h.astype(w2_ref.dtype)                     # back to MXU input dtype
    out = jnp.dot(h, w2_ref[...], preferred_element_type=jnp.float32) + b2_ref[...]
    o_ref[...] = out.astype(o_ref.dtype)


def _pick_tm(bz, fc_in_pad, hidden_pad, actions_pad,
             in_itemsize, w_itemsize, out_itemsize, row_align, budget):
    """Largest batch tile that fits the VMEM budget, with dual-TC & padding guards."""
    bz_al = _round_up(max(bz, 1), row_align)

    def vmem_bytes(t):
        return (2 * t * fc_in_pad * in_itemsize             # x tiles (double-buffered)
                + 2 * t * actions_pad * out_itemsize        # out tiles (double-buffered)
                + 2 * fc_in_pad * hidden_pad * w_itemsize   # W1 (2 bufs by default)
                + 2 * hidden_pad * actions_pad * w_itemsize # W2 (2 bufs by default)
                + 2 * (hidden_pad + actions_pad) * 4        # biases (f32, 2 bufs)
                + t * hidden_pad * 4                        # f32 hidden temp
                + t * fc_in_pad * w_itemsize)               # casted-x temp

    # Keep >= 2 grid steps when the batch allows it (v7x has 2 TensorCores;
    # the extra grid step costs ~0.35us on single-TC parts, negligible).
    half = _round_up((bz_al + 1) // 2, row_align)
    for t in (512, 256, 128, 64, 32, 16, 8):
        if t < row_align:
            break
        if t > bz_al:                         # would only add batch-padding waste
            continue
        if bz_al >= 2 * row_align and t > half:
            continue
        if vmem_bytes(t) <= budget:
            return t
    return row_align


@functools.partial(jax.jit, static_argnames=("actions_dim", "compute_dtype"))
def network_forward(states, w1_pad, b1_pad, w2_pad, b2_pad, *,
                    actions_dim, compute_dtype):
    """states: (B, *state_shape). Weights pre-padded/cast. Returns (B, actions) f32."""
    bz = states.shape[0]
    x = states.reshape(bz, -1)                   # == states.view(bz, -1), stays f32
    fc_in = x.shape[1]

    fc_in_pad = w1_pad.shape[0]
    hidden_pad = w1_pad.shape[1]
    actions_pad = w2_pad.shape[1]

    in_itemsize = jnp.dtype(x.dtype).itemsize
    w_itemsize = jnp.dtype(compute_dtype).itemsize
    out_itemsize = w_itemsize
    row_align = 16 if w_itemsize < 4 else 8      # bf16 packs two rows per sublane

    cap = _vmem_capacity_bytes()
    vmem_limit = cap // 2                        # ~64 MiB v5e/v6e, ~32 MiB v7x
    budget = int(vmem_limit * 0.9)               # headroom for compiler scratch

    tm = _pick_tm(bz, fc_in_pad, hidden_pad, actions_pad,
                  in_itemsize, w_itemsize, out_itemsize, row_align, budget)
    b_pad = _round_up(bz, tm)

    # Pad only the ragged edges of x (no dtype conversion here).
    pad_rows = b_pad - bz
    pad_cols = fc_in_pad - fc_in
    if pad_rows or pad_cols:
        x = jnp.pad(x, ((0, pad_rows), (0, pad_cols)))

    flops = 2 * b_pad * (fc_in_pad * hidden_pad + hidden_pad * actions_pad)
    bytes_accessed = (b_pad * fc_in_pad * in_itemsize
                      + fc_in_pad * hidden_pad * w_itemsize
                      + hidden_pad * actions_pad * w_itemsize
                      + (hidden_pad + actions_pad) * 4
                      + b_pad * actions_pad * out_itemsize)

    out_pad = pl.pallas_call(
        _mlp_kernel,
        out_shape=jax.ShapeDtypeStruct((b_pad, actions_pad), compute_dtype),
        grid=(b_pad // tm,),
        in_specs=[
            pl.BlockSpec((tm, fc_in_pad), lambda i: (i, 0)),          # x: per batch tile
            pl.BlockSpec((fc_in_pad, hidden_pad), lambda i: (0, 0)),  # W1: resident
            pl.BlockSpec((1, hidden_pad), lambda i: (0, 0)),          # b1: resident
            pl.BlockSpec((hidden_pad, actions_pad), lambda i: (0, 0)),  # W2: resident
            pl.BlockSpec((1, actions_pad), lambda i: (0, 0)),         # b2: resident
        ],
        out_specs=pl.BlockSpec((tm, actions_pad), lambda i: (i, 0)),
        compiler_params=pltpu.CompilerParams(
            dimension_semantics=("parallel",),    # shard batch tiles across TCs (v7x)
            vmem_limit_bytes=vmem_limit,
        ),
        cost_estimate=pl.CostEstimate(
            flops=flops, transcendentals=0, bytes_accessed=bytes_accessed),
    )(x, w1_pad, b1_pad, w2_pad, b2_pad)

    return out_pad[:bz, :actions_dim].astype(jnp.float32)


class NetworkPallas:
    """JAX/Pallas port of the PyTorch `Network` module."""

    def __init__(self, state_shape, hidden_dim, actions_dim, nc,
                 remove_features=False, key=None, compute_dtype=jnp.bfloat16):
        self.remove_features = remove_features
        # Mirrors torch: remove_features only shrinks state_shape (and thus
        # fc_in) at construction time; forward() flattens whatever it is given.
        if remove_features:
            state_shape = list(state_shape)[:-1] + [list(state_shape)[-1] - nc + 1]
        self.state_shape = tuple(state_shape)
        self.hidden_dim = hidden_dim
        self.actions_dim = actions_dim
        self.nc = nc
        self.compute_dtype = compute_dtype

        fc_in = int(np.prod(self.state_shape))
        self.fc_in = fc_in
        # Lane-dense padded dims (zeros are exact no-ops for matmul+bias+ReLU).
        self.fc_in_pad = _round_up(fc_in, 128)
        self.hidden_pad = _round_up(hidden_dim, 128)
        self.actions_pad = _round_up(actions_dim, 128)

        if key is None:
            key = jax.random.PRNGKey(0)
        k1, k2, k3, k4 = jax.random.split(key, 4)
        # Uniform init a la torch.nn.Linear (+/- 1/sqrt(fan_in)).
        lim1 = 1.0 / np.sqrt(fc_in)
        lim2 = 1.0 / np.sqrt(hidden_dim)
        # Weights stored transposed vs torch: (in, out).
        self.w1 = jax.random.uniform(k1, (fc_in, hidden_dim), jnp.float32, -lim1, lim1)
        self.b1 = jax.random.uniform(k2, (hidden_dim,), jnp.float32, -lim1, lim1)
        self.w2 = jax.random.uniform(k3, (hidden_dim, actions_dim), jnp.float32, -lim2, lim2)
        self.b2 = jax.random.uniform(k4, (actions_dim,), jnp.float32, -lim2, lim2)

        # Pre-padded / pre-cast parameter cache, keyed by compute dtype name,
        # so the jitted forward never re-pads weights.
        self._param_cache = {}
        self._prepared(self.compute_dtype)

    def _prepared(self, dt):
        key = jnp.dtype(dt).name
        if key not in self._param_cache:
            w1p = jnp.pad(self.w1.astype(dt),
                          ((0, self.fc_in_pad - self.fc_in),
                           (0, self.hidden_pad - self.hidden_dim)))
            b1p = jnp.pad(self.b1.astype(jnp.float32),
                          (0, self.hidden_pad - self.hidden_dim)).reshape(1, -1)
            w2p = jnp.pad(self.w2.astype(dt),
                          ((0, self.hidden_pad - self.hidden_dim),
                           (0, self.actions_pad - self.actions_dim)))
            b2p = jnp.pad(self.b2.astype(jnp.float32),
                          (0, self.actions_pad - self.actions_dim)).reshape(1, -1)
            self._param_cache[key] = (w1p, b1p, w2p, b2p)
        return self._param_cache[key]

    def __call__(self, states, compute_dtype=None):
        dt = self.compute_dtype if compute_dtype is None else compute_dtype
        w1p, b1p, w2p, b2p = self._prepared(dt)
        return network_forward(states, w1p, b1p, w2p, b2p,
                               actions_dim=self.actions_dim, compute_dtype=dt)


if __name__ == "__main__":
    # Small shapes consistent with the module: state_shape=(C,H,W)=(4,8,8),
    # hidden_dim=32, actions_dim=8, batch=2.
    state_shape = (4, 8, 8)
    hidden_dim = 32
    actions_dim = 8
    nc = 4
    batch = 2

    key = jax.random.PRNGKey(0)
    key_params, key_x = jax.random.split(key)

    net = NetworkPallas(state_shape, hidden_dim, actions_dim, nc,
                        remove_features=False, key=key_params)

    states = jax.random.normal(key_x, (batch,) + state_shape, jnp.float32)

    # Plain-JAX f32 reference.
    x = states.reshape(batch, -1)
    ref = jnp.maximum(x @ net.w1 + net.b1, 0.0) @ net.w2 + net.b2
    ref = np.asarray(jax.block_until_ready(ref))

    # 1) f32 compute path: tight tolerance.
    out_f32 = jax.block_until_ready(net(states, compute_dtype=jnp.float32))
    assert out_f32.shape == (batch, actions_dim)
    np.testing.assert_allclose(np.asarray(out_f32), ref, rtol=1e-5, atol=1e-5)

    # 2) bf16 MXU inputs with f32 accumulation (default fast path): loose tolerance.
    out_bf16 = jax.block_until_ready(net(states))
    assert out_bf16.shape == (batch, actions_dim)
    np.testing.assert_allclose(np.asarray(out_bf16), ref, rtol=2e-2, atol=2e-2)

    print("KERNEL_OK")
</pallas_src>

<mosaic_0001>
module attributes {stable_mosaic.version = 11 : i64} {
  func.func @_mlp_kernel(%arg0: i32, %arg1: memref<8x256xf32, #tpu.memory_space<vmem>>, %arg2: memref<256x128xf32, #tpu.memory_space<vmem>>, %arg3: memref<1x128xf32, #tpu.memory_space<vmem>>, %arg4: memref<128x128xf32, #tpu.memory_space<vmem>>, %arg5: memref<1x128xf32, #tpu.memory_space<vmem>>, %arg6: memref<8x128xf32, #tpu.memory_space<vmem>>) attributes {dimension_semantics = [#tpu.dimension_semantics<parallel>], iteration_bounds = array<i64: 1>, scalar_prefetch = 0 : i64, scratch_operands = 0 : i64, tpu.core_type = #tpu.core_type<tc>, window_params = [{transform_indices = @transform_0, window_bounds = array<i64: 8, 256>}, {pipeline_mode = #tpu.pipeline_mode<synchronous>, transform_indices = @transform_1, window_bounds = array<i64: 256, 128>}, {pipeline_mode = #tpu.pipeline_mode<synchronous>, transform_indices = @transform_2, window_bounds = array<i64: 1, 128>}, {pipeline_mode = #tpu.pipeline_mode<synchronous>, transform_indices = @transform_3, window_bounds = array<i64: 128, 128>}, {pipeline_mode = #tpu.pipeline_mode<synchronous>, transform_indices = @transform_4, window_bounds = array<i64: 1, 128>}, {transform_indices = @transform_5, window_bounds = array<i64: 8, 128>}]} {
    %c0 = arith.constant 0 : index
    %c0_0 = arith.constant 0 : index
    %0 = vector.load %arg1[%c0, %c0_0] : memref<8x256xf32, #tpu.memory_space<vmem>>, vector<8x256xf32>
    %c0_1 = arith.constant 0 : index
    %c0_2 = arith.constant 0 : index
    %1 = vector.load %arg2[%c0_1, %c0_2] : memref<256x128xf32, #tpu.memory_space<vmem>>, vector<256x128xf32>
    %cst = arith.constant dense<0.000000e+00> : vector<8x128xf32>
    %2 = tpu.matmul %0, %1, %cst {dimension_numbers = #tpu.dot_dimension_numbers<[1], [0], [0], [1], [0, 0, 1, 1], [], []>} : vector<8x256xf32>, vector<256x128xf32>, vector<8x128xf32> -> vector<8x128xf32>
    %c0_3 = arith.constant 0 : index
    %c0_4 = arith.constant 0 : index
    %3 = vector.load %arg3[%c0_3, %c0_4] : memref<1x128xf32, #tpu.memory_space<vmem>>, vector<1x128xf32>
    %4 = vector.broadcast %3 : vector<1x128xf32> to vector<8x128xf32>
    %5 = arith.addf %2, %4 : vector<8x128xf32>
    %cst_5 = arith.constant 0.000000e+00 : f32
    %6 = vector.broadcast %cst_5 : f32 to vector<8x128xf32>
    %7 = arith.maximumf %5, %6 : vector<8x128xf32>
    %c0_6 = arith.constant 0 : index
    %c0_7 = arith.constant 0 : index
    %8 = vector.load %arg4[%c0_6, %c0_7] : memref<128x128xf32, #tpu.memory_space<vmem>>, vector<128x128xf32>
    %cst_8 = arith.constant dense<0.000000e+00> : vector<8x128xf32>
    %9 = tpu.matmul %7, %8, %cst_8 {dimension_numbers = #tpu.dot_dimension_numbers<[1], [0], [0], [1], [0, 0, 1, 1], [], []>} : vector<8x128xf32>, vector<128x128xf32>, vector<8x128xf32> -> vector<8x128xf32>
    %c0_9 = arith.constant 0 : index
    %c0_10 = arith.constant 0 : index
    %10 = vector.load %arg5[%c0_9, %c0_10] : memref<1x128xf32, #tpu.memory_space<vmem>>, vector<1x128xf32>
    %11 = vector.broadcast %10 : vector<1x128xf32> to vector<8x128xf32>
    %12 = arith.addf %9, %11 : vector<8x128xf32>
    %c0_11 = arith.constant 0 : index
    %c0_12 = arith.constant 0 : index
    %13 = vector.load %arg6[%c0_11, %c0_12] : memref<8x128xf32, #tpu.memory_space<vmem>>, vector<8x128xf32>
    tpu.vector_store %arg6[%c0_11, %c0_12], %12 {strides = array<i32>} : memref<8x128xf32, #tpu.memory_space<vmem>>, vector<8x128xf32>,
    return
  }
  func.func @transform_0(%arg0: i32) -> (i32, i32) {
    %c0_i32 = arith.constant 0 : i32
    %c0_i32_0 = arith.constant 0 : i32
    return %arg0, %c0_i32 : i32, i32
  }
  func.func @transform_1(%arg0: i32) -> (i32, i32) {
    %c0_i32 = arith.constant 0 : i32
    %c0_i32_0 = arith.constant 0 : i32
    %c0_i32_1 = arith.constant 0 : i32
    return %c0_i32, %c0_i32_0 : i32, i32
  }
  func.func @transform_2(%arg0: i32) -> (i32, i32) {
    %c0_i32 = arith.constant 0 : i32
    %c0_i32_0 = arith.constant 0 : i32
    %c0_i32_1 = arith.constant 0 : i32
    return %c0_i32, %c0_i32_0 : i32, i32
  }
  func.func @transform_3(%arg0: i32) -> (i32, i32) {
    %c0_i32 = arith.constant 0 : i32
    %c0_i32_0 = arith.constant 0 : i32
    %c0_i32_1 = arith.constant 0 : i32
    return %c0_i32, %c0_i32_0 : i32, i32
  }
  func.func @transform_4(%arg0: i32) -> (i32, i32) {
    %c0_i32 = arith.constant 0 : i32
    %c0_i32_0 = arith.constant 0 : i32
    %c0_i32_1 = arith.constant 0 : i32
    return %c0_i32, %c0_i32_0 : i32, i32
  }
  func.func @transform_5(%arg0: i32) -> (i32, i32) {
    %c0_i32 = arith.constant 0 : i32
    %c0_i32_0 = arith.constant 0 : i32
    return %arg0, %c0_i32 : i32, i32
  }
}

</mosaic_0001>

<bundles_post_ra>
// kernel: network_forward.1
= control target key start
LH: loop header
LB: loop body
LE: loop exit
PB: predicated region body
PF: predicated region fallthrough
CT: control target
= control target key end

     0   :  { %10 = vsyncpa [#allocation3], 0  ;;  %s291_s0 = inlined_call_operand.vmem [shape: f32[8,256], index: 0, kind: input, shape index: {}]   ;;  %s292_s1 = inlined_call_operand.hbm [shape: f32[256,128], index: 1, kind: input, shape index: {}]   ;;  %s293_s2 = inlined_call_operand.vmem [shape: f32[1,128], index: 2, kind: input, shape index: {}]   ;;  %s294_s3 = inlined_call_operand.hbm [shape: f32[128,128], index: 3, kind: input, shape index: {}]   ;;  %s295_s4 = inlined_call_operand.vmem [shape: f32[1,128], index: 4, kind: input, shape index: {}]   ;;  %s296_s5 = inlined_call_operand.vmem [shape: f32[8,128], index: 5, kind: output, shape index: {}]  }
   0x1   :  { %s18_s20 = sshll.u32 %s292_s1, 4  ;;  %s19_s20 = int_to_ptr.hbm [resolvable:$true] %s18_s20 }
   0x2   :  { %11 = vsyncpa [#allocation5], 0  ;;  %s236_s21 = smov [#allocation2]   ;;  %s33_s25 = sshll.u32 %s294_s3, 4  ;;  %s34_s25 = int_to_ptr.hbm [resolvable:$true] %s33_s25 }
   0x3   :  { %s20_s22 = sshll.u32 %s236_s21, 4  ;;  %s237_s26 = smov 128   ;;  %s21_s22 = int_to_ptr.vmem [resolvable:$true] %s20_s22 }
   0x4   :  { %s238_s27 = smov 8   ;;  %s239_s28 = smov [#allocation4]  }
   0x5   :  { %26 = dma.hbm_to_vmem [thread:$0]  %s19_s20, 4096, %s21_s22, [#allocation3], %s237_s26, %s237_s26, %s238_s27  }
   0x6   :  { %s35_s29 = sshll.u32 %s239_s28, 4  ;;  %s36_s29 = int_to_ptr.vmem [resolvable:$true] %s35_s29 }
   0x7   :  { %41 = dma.hbm_to_vmem [thread:$0]  %s34_s25, 2048, %s36_s29, [#allocation5], %s237_s26, %s237_s26, %s238_s27  }
   0x8   :  { %232 = dma.done.wait [#allocation3], 4096  }
   0x9   :  { %233 = vsyncadd [#allocation3], 4294963200 }
   0xa   :  { %234 = dma.done.wait [#allocation5], 2048  }
   0xb   :  { %235 = vsyncadd [#allocation5], 4294965248  ;;  %v69_v0 = vld [vmem:[#allocation2 + $0x78] sm:$0xff]  ;;  %v68_v1 = vld [vmem:[#allocation2 + $0x70] sm:$0xff] }
   0xc   :  { %v85_v2 = vld [vmem:[#allocation2 + $0xf8] sm:$0xff]  ;;  %90 = vmatpush.msra.mxu0 %v69_v0  ;;  %v84_v3 = vld [vmem:[#allocation2 + $0xf0] sm:$0xff]  ;;  %v67_v4 = vld [vmem:[#allocation2 + $0x68] sm:$0xff] }
   0xd   :  { %110 = vmatpush.msra.mxu1 %v85_v2  ;;  %v83_v5 = vld [vmem:[#allocation2 + $0xe8] sm:$0xff]  ;;  %v66_v6 = vld [vmem:[#allocation2 + $0x60] sm:$0xff]  ;;  %v65_v8 = vld [vmem:[#allocation2 + $0x58] sm:$0xff] }
   0xe   :  { %91 = vmatpush.msra.mxu0 %v68_v1  ;;  %v82_v7 = vld [vmem:[#allocation2 + $0xe0] sm:$0xff]  ;;  %v81_v9 = vld [vmem:[#allocation2 + $0xd8] sm:$0xff]  ;;  %v64_v10 = vld [vmem:[#allocation2 + $0x50] sm:$0xff] }
   0xf   :  { %111 = vmatpush.msra.mxu1 %v84_v3  ;;  %v80_v11 = vld [vmem:[#allocation2 + $0xd0] sm:$0xff]  ;;  %v63_v12 = vld [vmem:[#allocation2 + $0x48] sm:$0xff]  ;;  %v146_v14 = vld [vmem:[#allocation4 + $0x78] sm:$0xff] }
  0x10   :  { %92 = vmatpush.msra.mxu0 %v67_v4  ;;  %v79_v13 = vld [vmem:[#allocation2 + $0xc8] sm:$0xff]  ;;  %v145_v15 = vld [vmem:[#allocation4 + $0x70] sm:$0xff]  ;;  %v62_v16 = vld [vmem:[#allocation2 + $0x40] sm:$0xff]  ;;  %151 = vmatpush.msra.mxu2 %v146_v14 }
  0x11   :  { %112 = vmatpush.msra.mxu1 %v83_v5  ;;  %v78_v17 = vld [vmem:[#allocation2 + $0xc0] sm:$0xff]  ;;  %v144_v18 = vld [vmem:[#allocation4 + $0x68] sm:$0xff]  ;;  %v61_v19 = vld [vmem:[#allocation2 + $0x38] sm:$0xff] }
  0x12   :  { %93 = vmatpush.msra.mxu0 %v66_v6  ;;  %v77_v20 = vld [vmem:[#allocation2 + $0xb8] sm:$0xff]  ;;  %152 = vmatpush.msra.mxu2 %v145_v15  ;;  %v143_v21 = vld [vmem:[#allocation4 + $0x60] sm:$0xff]  ;;  %v60_v22 = vld [vmem:[#allocation2 + $0x30] sm:$0xff] }
  0x13   :  { %113 = vmatpush.msra.mxu1 %v82_v7  ;;  %v76_v23 = vld [vmem:[#allocation2 + $0xb0] sm:$0xff]  ;;  %v142_v24 = vld [vmem:[#allocation4 + $0x58] sm:$0xff]  ;;  %v59_v25 = vld [vmem:[#allocation2 + $0x28] sm:$0xff] }
  0x14   :  { %94 = vmatpush.msra.mxu0 %v65_v8  ;;  %153 = vmatpush.msra.mxu2 %v144_v18  ;;  %v75_v26 = vld [vmem:[#allocation2 + $0xa8] sm:$0xff]  ;;  %v141_v27 = vld [vmem:[#allocation4 + $0x50] sm:$0xff]  ;;  %v58_v28 = vld [vmem:[#allocation2 + $0x20] sm:$0xff] }
  0x15   :  { %114 = vmatpush.msra.mxu1 %v81_v9  ;;  %v74_v29 = vld [vmem:[#allocation2 + $0xa0] sm:$0xff]  ;;  %v140_v30 = vld [vmem:[#allocation4 + $0x48] sm:$0xff]  ;;  %v57_v31 = vld [vmem:[#allocation2 + $0x18] sm:$0xff] }
  0x16   :  { %95 = vmatpush.msra.mxu0 %v64_v10  ;;  %154 = vmatpush.msra.mxu2 %v143_v21  ;;  %v73_v32 = vld [vmem:[#allocation2 + $0x98] sm:$0xff]  ;;  %v139_v33 = vld [vmem:[#allocation4 + $0x40] sm:$0xff]  ;;  %v56_v34 = vld [vmem:[#allocation2 + $0x10] sm:$0xff] }
  0x17   :  { %115 = vmatpush.msra.mxu1 %v80_v11  ;;  %v72_v35 = vld [vmem:[#allocation2 + $0x90] sm:$0xff]  ;;  %v138_v36 = vld [vmem:[#allocation4 + $0x38] sm:$0xff]  ;;  %v55_v37 = vld [vmem:[#allocation2 + $0x8] sm:$0xff] }
  0x18   :  { %96 = vmatpush.msra.mxu0 %v63_v12  ;;  %155 = vmatpush.msra.mxu2 %v142_v24  ;;  %v71_v38 = vld [vmem:[#allocation2 + $0x88] sm:$0xff]  ;;  %v137_v39 = vld [vmem:[#allocation4 + $0x30] sm:$0xff]  ;;  %v54_v40 = vld [vmem:[#allocation2] sm:$0xff] }
  0x19   :  { %116 = vmatpush.msra.mxu1 %v79_v13  ;;  %v70_v41 = vld [vmem:[#allocation2 + $0x80] sm:$0xff]  ;;  %v53_v43 = vld [vmem:[%s291_s0 + $0x8] sm:$0xff]  ;;  %v134_v46 = vld [vmem:[#allocation4 + $0x18] sm:$0xff] }
  0x1a   :  { %97 = vmatpush.msra.mxu0 %v62_v16  ;;  %156 = vmatpush.msra.mxu2 %v141_v27  ;;  %v52_v42 = vld [vmem:[%s291_s0] sm:$0xff]  ;;  %v136_v44 = vld [vmem:[#allocation4 + $0x28] sm:$0xff]  ;;  %v133_v47 = vld [vmem:[#allocation4 + $0x10] sm:$0xff] }
  0x1b   :  { %117 = vmatpush.msra.mxu1 %v78_v17  ;;  %v135_v45 = vld [vmem:[#allocation4 + $0x20] sm:$0xff]  ;;  %v132_v48 = vld [vmem:[#allocation4 + $0x8] sm:$0xff] }
  0x1c   :  { %98 = vmatpush.msra.mxu0 %v61_v19  ;;  %157 = vmatpush.msra.mxu2 %v140_v30  ;;  %v131_v49 = vld [vmem:[#allocation4] sm:$0xff] }
  0x1d   :  { %118 = vmatpush.msra.mxu1 %v77_v20  ;;  %v182_v50 = vld [vmem:[%s293_s2] ss:$0 sm:$0xff] }
  0x1e   :  { %99 = vmatpush.msra.mxu0 %v60_v22  ;;  %158 = vmatpush.msra.mxu2 %v139_v33  ;;  %v183_v56 = vld [vmem:[%s295_s4] ss:$0 sm:$0xff] }
  0x1f   :  { %119 = vmatpush.msra.mxu1 %v76_v23 }
  0x20   :  { %100 = vmatpush.msra.mxu0 %v59_v25  ;;  %159 = vmatpush.msra.mxu2 %v138_v36 }
  0x21   :  { %120 = vmatpush.msra.mxu1 %v75_v26 }
  0x22   :  { %101 = vmatpush.msra.mxu0 %v58_v28  ;;  %160 = vmatpush.msra.mxu2 %v137_v39 }
  0x23   :  { %121 = vmatpush.msra.mxu1 %v74_v29 }
  0x24   :  { %102 = vmatpush.msra.mxu0 %v57_v31  ;;  %161 = vmatpush.msra.mxu2 %v136_v44 }
  0x25   :  { %122 = vmatpush.msra.mxu1 %v73_v32 }
  0x26   :  { %103 = vmatpush.msra.mxu0 %v56_v34  ;;  %162 = vmatpush.msra.mxu2 %v135_v45 }
  0x27   :  { %123 = vmatpush.msra.mxu1 %v72_v35 }
  0x28   :  { %104 = vmatpush.msra.mxu0 %v55_v37  ;;  %163 = vmatpush.msra.mxu2 %v134_v46 }
  0x29   :  { %124 = vmatpush.msra.mxu1 %v71_v38 }
  0x2a   :  { %105 = vmatpush.msra.mxu0 %v54_v40  ;;  %164 = vmatpush.msra.mxu2 %v133_v47 }
  0x2b   :  { %125 = vmatpush.msra.mxu1 %v70_v41  ;;  %106 = vmatmul.f32.vlgmr.msra.gmra.mxu0 %v52_v42 }
  0x2c   :  { %126 = vmatmul.f32.vlgmr.msra.gmra.mxu1 %v53_v43  ;;  %165 = vmatpush.msra.mxu2 %v132_v48 }
  0x2e   :  { %166 = vmatpush.msra.mxu2 %v131_v49 }
  0xa8   :  { %v107_v51 = vpop.f32.mrf.mxu0 }
  0xa9   :  { %v127_v52 = vpop.f32.mrf.mxu1  ;;  %v108_v53 = vadd.f32 %v182_v50, %v107_v51 }
  0xab   :  { %v128_v54 = vadd.f32 %v127_v52, %v108_v53 }
  0xad   :  { %v130_v55 = vmax.f32 %v128_v54, 0.0 }
  0xaf   :  { %167 = vmatmul.f32.vlgmr.msra.gmra.mxu2 %v130_v55 }
 0x132   :  { %v168_v57 = vpop.f32.mrf.mxu2 }
 0x133   :  { %v169_v58 = vadd.f32 %v183_v56, %v168_v57 }
 0x135   :  { %171 = vst [vmem:[%s296_s5] sm:$0xff] %v169_v58 }
 0x136   :  { %176 = vsyncpa [#allocation3], 1 }
 0x137   :  { %177 = vsyncpa [#allocation5], 1 }

</bundles_post_ra>
